<compile_context>
chip_gen: v6e
topology: v6e:2x2x1
jax: 0.10.0
libtpu: 0.0.40
codegen_flags: <defaults>
</compile_context>

<pallas_src>
import functools

import jax
import jax.numpy as jnp
from jax.experimental import pallas as pl
from jax.experimental.pallas import tpu as pltpu


def _round_up(x: int, m: int) -> int:
    return ((x + m - 1) // m) * m


# ----------------------------- Pallas kernel ------------------------------ #

def node_decoder_kernel(z_ref, w1_ref, b1_ref,
                        w2f_ref, b2f_ref, w2n_ref, b2n_ref,
                        wf_ref, bf_ref, wn_ref, bn_ref,
                        feat_ref, nb_ref, *, inv_temp: float):
    wdt = w1_ref.dtype                       # compute dtype of the weights
    z = z_ref[...]

    # latent_decode + ReLU -> [TN, reparam_dim]
    h1 = jnp.dot(z, w1_ref[...], preferred_element_type=jnp.float32)
    h1 = jnp.maximum(h1 + b1_ref[...].astype(jnp.float32), 0.0).astype(wdt)

    # reparam_decode split into the two torch.chunk halves + ReLU
    feat_in = jnp.dot(h1, w2f_ref[...], preferred_element_type=jnp.float32)
    feat_in = jnp.maximum(feat_in + b2f_ref[...].astype(jnp.float32), 0.0).astype(wdt)

    nb_in = jnp.dot(h1, w2n_ref[...], preferred_element_type=jnp.float32)
    nb_in = jnp.maximum(nb_in + b2n_ref[...].astype(jnp.float32), 0.0).astype(wdt)

    # feat_decode -> sigmoid
    feat = jnp.dot(feat_in, wf_ref[...], preferred_element_type=jnp.float32)
    feat = feat + bf_ref[...].astype(jnp.float32)
    feat_ref[...] = jax.nn.sigmoid(feat).astype(feat_ref.dtype)

    # neighbor_decode -> sigmoid(x / temp)
    nb = jnp.dot(nb_in, wn_ref[...], preferred_element_type=jnp.float32)
    nb = nb + bn_ref[...].astype(jnp.float32)
    nb_ref[...] = jax.nn.sigmoid(nb * inv_temp).astype(nb_ref.dtype)


# ------------------------------ JAX wrapper -------------------------------- #

def node_decoder_forward(z, params, temp=0.5, *, row_tile=256,
                         out_dtype=jnp.float32):
    w1, b1, w2, b2, wf, bf, wn, bn = params
    n, latent_dim = z.shape
    hidden = w2.shape[1] // 2
    feat_dim = wf.shape[1]
    nb_dim = wn.shape[1]

    # torch.chunk(h2, 2, dim=-1): first half feeds feat_decode, second half
    # feeds neighbor_decode -> split the reparam_decode weight columns.
    w2f, w2n = w2[:, :hidden], w2[:, hidden:]
    b2f, b2n = b2[:, :hidden], b2[:, hidden:]

    # Pad output lane dims to multiples of 128 for lane-dense (unmasked) stores.
    feat_pad = _round_up(feat_dim, 128)
    nb_pad = _round_up(nb_dim, 128)
    if feat_pad != feat_dim:
        wf = jnp.pad(wf, ((0, 0), (0, feat_pad - feat_dim)))
        bf = jnp.pad(bf, ((0, 0), (0, feat_pad - feat_dim)))
    if nb_pad != nb_dim:
        wn = jnp.pad(wn, ((0, 0), (0, nb_pad - nb_dim)))
        bn = jnp.pad(bn, ((0, 0), (0, nb_pad - nb_dim)))

    # Row tiling over N; pad N to a whole number of tiles (sliced off at the end).
    tn = min(int(row_tile), _round_up(n, 8))
    n_pad = _round_up(n, tn)
    if n_pad != n:
        z = jnp.pad(z, ((0, n_pad - n), (0, 0)))
    grid = (n_pad // tn,)

    def full_spec(a):
        # whole array, constant block index -> stays resident across grid steps
        return pl.BlockSpec(a.shape, lambda i: (0, 0))

    kernel = functools.partial(node_decoder_kernel, inv_temp=float(1.0 / temp))

    feat_p, nb_p = pl.pallas_call(
        kernel,
        grid=grid,
        in_specs=[
            pl.BlockSpec((tn, latent_dim), lambda i: (i, 0)),   # z (streamed)
            full_spec(w1), full_spec(b1),
            full_spec(w2f), full_spec(b2f),
            full_spec(w2n), full_spec(b2n),
            full_spec(wf), full_spec(bf),
            full_spec(wn), full_spec(bn),
        ],
        out_specs=(
            pl.BlockSpec((tn, feat_pad), lambda i: (i, 0)),
            pl.BlockSpec((tn, nb_pad), lambda i: (i, 0)),
        ),
        out_shape=(
            jax.ShapeDtypeStruct((n_pad, feat_pad), out_dtype),
            jax.ShapeDtypeStruct((n_pad, nb_pad), out_dtype),
        ),
        compiler_params=pltpu.CompilerParams(
            dimension_semantics=("parallel",)),
    )(z, w1, b1, w2f, b2f, w2n, b2n, wf, bf, wn, bn)

    return feat_p[:n, :feat_dim], nb_p[:n, :nb_dim]


# ------------------------------ param helpers ------------------------------ #

def init_linear(key, in_dim, out_dim):
    """nn.Linear-style init: W as [in_dim, out_dim] (transposed), b as [1, out]."""
    kw, kb = jax.random.split(key)
    bound = 1.0 / jnp.sqrt(jnp.float32(in_dim))
    w = jax.random.uniform(kw, (in_dim, out_dim), jnp.float32, -bound, bound)
    b = jax.random.uniform(kb, (1, out_dim), jnp.float32, -bound, bound)
    return w, b


def make_params(key, latent_dim, reparam_dim, hidden_dim, feat_dim,
                neighbor_map_dim):
    k1, k2, k3, k4 = jax.random.split(key, 4)
    w1, b1 = init_linear(k1, latent_dim, reparam_dim)          # latent_decode
    w2, b2 = init_linear(k2, reparam_dim, hidden_dim * 2)      # reparam_decode
    wf, bf = init_linear(k3, hidden_dim, feat_dim)             # feat_decode
    wn, bn = init_linear(k4, hidden_dim, neighbor_map_dim)     # neighbor_decode
    return (w1, b1, w2, b2, wf, bf, wn, bn)


def cast_params(params, dtype):
    return tuple(p.astype(dtype) for p in params)


def node_decoder_reference(z, params, temp=0.5):
    """Pure-JAX f32 reference of the PyTorch forward."""
    w1, b1, w2, b2, wf, bf, wn, bn = [p.astype(jnp.float32) for p in params]
    z = z.astype(jnp.float32)
    h1 = jax.nn.relu(z @ w1 + b1)
    h2 = jax.nn.relu(h1 @ w2 + b2)
    hidden = h2.shape[-1] // 2
    feat = jax.nn.sigmoid(h2[:, :hidden] @ wf + bf)
    nb = jax.nn.sigmoid((h2[:, hidden:] @ wn + bn) / temp)
    return feat, nb


# --------------------------------- main ------------------------------------ #

if __name__ == "__main__":
    # Small shapes consistent with the module (real module: 64/128/256/512/2708).
    latent_dim = 64
    reparam_dim = 128
    hidden_dim = 128
    feat_dim = 256
    neighbor_map_dim = 300   # deliberately NOT a multiple of 128: exercises padding
    batch = 8
    temp = 0.5

    key = jax.random.PRNGKey(0)
    kz, kp = jax.random.split(key)

    z = jax.random.normal(kz, (batch, latent_dim), jnp.float32)
    params = make_params(kp, latent_dim, reparam_dim, hidden_dim,
                         feat_dim, neighbor_map_dim)

    # --- f32 path --------------------------------------------------------- #
    feat, neighbor_map = node_decoder_forward(z, params, temp=temp)
    jax.block_until_ready((feat, neighbor_map))

    feat_ref, nb_ref = node_decoder_reference(z, params, temp=temp)
    assert feat.shape == (batch, feat_dim)
    assert neighbor_map.shape == (batch, neighbor_map_dim)
    assert jnp.allclose(feat, feat_ref, atol=1e-5, rtol=1e-5)
    assert jnp.allclose(neighbor_map, nb_ref, atol=1e-5, rtol=1e-5)

    # --- bf16 params path (v6e/v7x fast path), multi-tile grid ------------ #
    batch2 = 40
    z2 = jax.random.normal(jax.random.PRNGKey(1), (batch2, latent_dim),
                           jnp.float32)
    params_bf16 = cast_params(params, jnp.bfloat16)
    feat2, nb2 = node_decoder_forward(z2.astype(jnp.bfloat16), params_bf16,
                                      temp=temp, row_tile=16)  # grid=(3,)
    jax.block_until_ready((feat2, nb2))
    feat2_ref, nb2_ref = node_decoder_reference(z2.astype(jnp.bfloat16),
                                                params_bf16, temp=temp)
    assert feat2.shape == (batch2, feat_dim)
    assert nb2.shape == (batch2, neighbor_map_dim)
    assert jnp.allclose(feat2, feat2_ref, atol=3e-2, rtol=0)
    assert jnp.allclose(nb2, nb2_ref, atol=3e-2, rtol=0)

    print("KERNEL_OK")
</pallas_src>

<mosaic_0001>
module attributes {stable_mosaic.version = 11 : i64} {
  func.func @node_decoder_kernel(%arg0: i32, %arg1: memref<8x64xf32, #tpu.memory_space<vmem>>, %arg2: memref<64x128xf32, #tpu.memory_space<vmem>>, %arg3: memref<1x128xf32, #tpu.memory_space<vmem>>, %arg4: memref<128x128xf32, #tpu.memory_space<vmem>>, %arg5: memref<1x128xf32, #tpu.memory_space<vmem>>, %arg6: memref<128x128xf32, #tpu.memory_space<vmem>>, %arg7: memref<1x128xf32, #tpu.memory_space<vmem>>, %arg8: memref<128x256xf32, #tpu.memory_space<vmem>>, %arg9: memref<1x256xf32, #tpu.memory_space<vmem>>, %arg10: memref<128x384xf32, #tpu.memory_space<vmem>>, %arg11: memref<1x384xf32, #tpu.memory_space<vmem>>, %arg12: memref<8x256xf32, #tpu.memory_space<vmem>>, %arg13: memref<8x384xf32, #tpu.memory_space<vmem>>) attributes {dimension_semantics = [#tpu.dimension_semantics<parallel>], iteration_bounds = array<i64: 1>, scalar_prefetch = 0 : i64, scratch_operands = 0 : i64, tpu.core_type = #tpu.core_type<tc>, window_params = [{transform_indices = @transform_0, window_bounds = array<i64: 8, 64>}, {pipeline_mode = #tpu.pipeline_mode<synchronous>, transform_indices = @transform_1, window_bounds = array<i64: 64, 128>}, {pipeline_mode = #tpu.pipeline_mode<synchronous>, transform_indices = @transform_2, window_bounds = array<i64: 1, 128>}, {pipeline_mode = #tpu.pipeline_mode<synchronous>, transform_indices = @transform_3, window_bounds = array<i64: 128, 128>}, {pipeline_mode = #tpu.pipeline_mode<synchronous>, transform_indices = @transform_4, window_bounds = array<i64: 1, 128>}, {pipeline_mode = #tpu.pipeline_mode<synchronous>, transform_indices = @transform_5, window_bounds = array<i64: 128, 128>}, {pipeline_mode = #tpu.pipeline_mode<synchronous>, transform_indices = @transform_6, window_bounds = array<i64: 1, 128>}, {pipeline_mode = #tpu.pipeline_mode<synchronous>, transform_indices = @transform_7, window_bounds = array<i64: 128, 256>}, {pipeline_mode = #tpu.pipeline_mode<synchronous>, transform_indices = @transform_8, window_bounds = array<i64: 1, 256>}, {pipeline_mode = #tpu.pipeline_mode<synchronous>, transform_indices = @transform_9, window_bounds = array<i64: 128, 384>}, {pipeline_mode = #tpu.pipeline_mode<synchronous>, transform_indices = @transform_10, window_bounds = array<i64: 1, 384>}, {transform_indices = @transform_11, window_bounds = array<i64: 8, 256>}, {transform_indices = @transform_12, window_bounds = array<i64: 8, 384>}]} {
    %c0 = arith.constant 0 : index
    %c0_0 = arith.constant 0 : index
    %0 = vector.load %arg1[%c0, %c0_0] : memref<8x64xf32, #tpu.memory_space<vmem>>, vector<8x64xf32>
    %c0_1 = arith.constant 0 : index
    %c0_2 = arith.constant 0 : index
    %1 = vector.load %arg2[%c0_1, %c0_2] : memref<64x128xf32, #tpu.memory_space<vmem>>, vector<64x128xf32>
    %cst = arith.constant dense<0.000000e+00> : vector<8x128xf32>
    %2 = tpu.matmul %0, %1, %cst {dimension_numbers = #tpu.dot_dimension_numbers<[1], [0], [0], [1], [0, 0, 1, 1], [], []>} : vector<8x64xf32>, vector<64x128xf32>, vector<8x128xf32> -> vector<8x128xf32>
    %c0_3 = arith.constant 0 : index
    %c0_4 = arith.constant 0 : index
    %3 = vector.load %arg3[%c0_3, %c0_4] : memref<1x128xf32, #tpu.memory_space<vmem>>, vector<1x128xf32>
    %4 = vector.broadcast %3 : vector<1x128xf32> to vector<8x128xf32>
    %5 = arith.addf %2, %4 : vector<8x128xf32>
    %cst_5 = arith.constant 0.000000e+00 : f32
    %6 = vector.broadcast %cst_5 : f32 to vector<8x128xf32>
    %7 = arith.maximumf %5, %6 : vector<8x128xf32>
    %c0_6 = arith.constant 0 : index
    %c0_7 = arith.constant 0 : index
    %8 = vector.load %arg4[%c0_6, %c0_7] : memref<128x128xf32, #tpu.memory_space<vmem>>, vector<128x128xf32>
    %cst_8 = arith.constant dense<0.000000e+00> : vector<8x128xf32>
    %9 = tpu.matmul %7, %8, %cst_8 {dimension_numbers = #tpu.dot_dimension_numbers<[1], [0], [0], [1], [0, 0, 1, 1], [], []>} : vector<8x128xf32>, vector<128x128xf32>, vector<8x128xf32> -> vector<8x128xf32>
    %c0_9 = arith.constant 0 : index
    %c0_10 = arith.constant 0 : index
    %10 = vector.load %arg5[%c0_9, %c0_10] : memref<1x128xf32, #tpu.memory_space<vmem>>, vector<1x128xf32>
    %11 = vector.broadcast %10 : vector<1x128xf32> to vector<8x128xf32>
    %12 = arith.addf %9, %11 : vector<8x128xf32>
    %cst_11 = arith.constant 0.000000e+00 : f32
    %13 = vector.broadcast %cst_11 : f32 to vector<8x128xf32>
    %14 = arith.maximumf %12, %13 : vector<8x128xf32>
    %c0_12 = arith.constant 0 : index
    %c0_13 = arith.constant 0 : index
    %15 = vector.load %arg6[%c0_12, %c0_13] : memref<128x128xf32, #tpu.memory_space<vmem>>, vector<128x128xf32>
    %cst_14 = arith.constant dense<0.000000e+00> : vector<8x128xf32>
    %16 = tpu.matmul %7, %15, %cst_14 {dimension_numbers = #tpu.dot_dimension_numbers<[1], [0], [0], [1], [0, 0, 1, 1], [], []>} : vector<8x128xf32>, vector<128x128xf32>, vector<8x128xf32> -> vector<8x128xf32>
    %c0_15 = arith.constant 0 : index
    %c0_16 = arith.constant 0 : index
    %17 = vector.load %arg7[%c0_15, %c0_16] : memref<1x128xf32, #tpu.memory_space<vmem>>, vector<1x128xf32>
    %18 = vector.broadcast %17 : vector<1x128xf32> to vector<8x128xf32>
    %19 = arith.addf %16, %18 : vector<8x128xf32>
    %cst_17 = arith.constant 0.000000e+00 : f32
    %20 = vector.broadcast %cst_17 : f32 to vector<8x128xf32>
    %21 = arith.maximumf %19, %20 : vector<8x128xf32>
    %c0_18 = arith.constant 0 : index
    %c0_19 = arith.constant 0 : index
    %22 = vector.load %arg8[%c0_18, %c0_19] : memref<128x256xf32, #tpu.memory_space<vmem>>, vector<128x256xf32>
    %cst_20 = arith.constant dense<0.000000e+00> : vector<8x256xf32>
    %23 = tpu.matmul %14, %22, %cst_20 {dimension_numbers = #tpu.dot_dimension_numbers<[1], [0], [0], [1], [0, 0, 1, 1], [], []>} : vector<8x128xf32>, vector<128x256xf32>, vector<8x256xf32> -> vector<8x256xf32>
    %c0_21 = arith.constant 0 : index
    %c0_22 = arith.constant 0 : index
    %24 = vector.load %arg9[%c0_21, %c0_22] : memref<1x256xf32, #tpu.memory_space<vmem>>, vector<1x256xf32>
    %25 = vector.broadcast %24 : vector<1x256xf32> to vector<8x256xf32>
    %26 = arith.addf %23, %25 : vector<8x256xf32>
    %27 = arith.negf %26 : vector<8x256xf32>
    %28 = math.exp %27 : vector<8x256xf32>
    %cst_23 = arith.constant 1.000000e+00 : f32
    %29 = vector.broadcast %cst_23 : f32 to vector<8x256xf32>
    %30 = arith.addf %29, %28 : vector<8x256xf32>
    %31 = arith.divf %29, %30 : vector<8x256xf32>
    %c0_24 = arith.constant 0 : index
    %c0_25 = arith.constant 0 : index
    %32 = vector.load %arg12[%c0_24, %c0_25] : memref<8x256xf32, #tpu.memory_space<vmem>>, vector<8x256xf32>
    tpu.vector_store %arg12[%c0_24, %c0_25], %31 {strides = array<i32>} : memref<8x256xf32, #tpu.memory_space<vmem>>, vector<8x256xf32>,
    %c0_26 = arith.constant 0 : index
    %c0_27 = arith.constant 0 : index
    %33 = vector.load %arg10[%c0_26, %c0_27] : memref<128x384xf32, #tpu.memory_space<vmem>>, vector<128x384xf32>
    %cst_28 = arith.constant dense<0.000000e+00> : vector<8x384xf32>
    %34 = tpu.matmul %21, %33, %cst_28 {dimension_numbers = #tpu.dot_dimension_numbers<[1], [0], [0], [1], [0, 0, 1, 1], [], []>} : vector<8x128xf32>, vector<128x384xf32>, vector<8x384xf32> -> vector<8x384xf32>
    %c0_29 = arith.constant 0 : index
    %c0_30 = arith.constant 0 : index
    %35 = vector.load %arg11[%c0_29, %c0_30] : memref<1x384xf32, #tpu.memory_space<vmem>>, vector<1x384xf32>
    %36 = vector.broadcast %35 : vector<1x384xf32> to vector<8x384xf32>
    %37 = arith.addf %34, %36 : vector<8x384xf32>
    %cst_31 = arith.constant 2.000000e+00 : f32
    %38 = vector.broadcast %cst_31 : f32 to vector<8x384xf32>
    %39 = arith.mulf %37, %38 : vector<8x384xf32>
    %40 = arith.negf %39 : vector<8x384xf32>
    %41 = math.exp %40 : vector<8x384xf32>
    %cst_32 = arith.constant 1.000000e+00 : f32
    %42 = vector.broadcast %cst_32 : f32 to vector<8x384xf32>
    %43 = arith.addf %42, %41 : vector<8x384xf32>
    %44 = arith.divf %42, %43 : vector<8x384xf32>
    %c0_33 = arith.constant 0 : index
    %c0_34 = arith.constant 0 : index
    %45 = vector.load %arg13[%c0_33, %c0_34] : memref<8x384xf32, #tpu.memory_space<vmem>>, vector<8x384xf32>
    tpu.vector_store %arg13[%c0_33, %c0_34], %44 {strides = array<i32>} : memref<8x384xf32, #tpu.memory_space<vmem>>, vector<8x384xf32>,
    return
  }
  func.func @transform_0(%arg0: i32) -> (i32, i32) {
    %c0_i32 = arith.constant 0 : i32
    %c0_i32_0 = arith.constant 0 : i32
    return %arg0, %c0_i32 : i32, i32
  }
  func.func @transform_1(%arg0: i32) -> (i32, i32) {
    %c0_i32 = arith.constant 0 : i32
    %c0_i32_0 = arith.constant 0 : i32
    %c0_i32_1 = arith.constant 0 : i32
    return %c0_i32, %c0_i32_0 : i32, i32
  }
  func.func @transform_2(%arg0: i32) -> (i32, i32) {
    %c0_i32 = arith.constant 0 : i32
    %c0_i32_0 = arith.constant 0 : i32
    %c0_i32_1 = arith.constant 0 : i32
    return %c0_i32, %c0_i32_0 : i32, i32
  }
  func.func @transform_3(%arg0: i32) -> (i32, i32) {
    %c0_i32 = arith.constant 0 : i32
    %c0_i32_0 = arith.constant 0 : i32
    %c0_i32_1 = arith.constant 0 : i32
    return %c0_i32, %c0_i32_0 : i32, i32
  }
  func.func @transform_4(%arg0: i32) -> (i32, i32) {
    %c0_i32 = arith.constant 0 : i32
    %c0_i32_0 = arith.constant 0 : i32
    %c0_i32_1 = arith.constant 0 : i32
    return %c0_i32, %c0_i32_0 : i32, i32
  }
  func.func @transform_5(%arg0: i32) -> (i32, i32) {
    %c0_i32 = arith.constant 0 : i32
    %c0_i32_0 = arith.constant 0 : i32
    %c0_i32_1 = arith.constant 0 : i32
    return %c0_i32, %c0_i32_0 : i32, i32
  }
  func.func @transform_6(%arg0: i32) -> (i32, i32) {
    %c0_i32 = arith.constant 0 : i32
    %c0_i32_0 = arith.constant 0 : i32
    %c0_i32_1 = arith.constant 0 : i32
    return %c0_i32, %c0_i32_0 : i32, i32
  }
  func.func @transform_7(%arg0: i32) -> (i32, i32) {
    %c0_i32 = arith.constant 0 : i32
    %c0_i32_0 = arith.constant 0 : i32
    %c0_i32_1 = arith.constant 0 : i32
    return %c0_i32, %c0_i32_0 : i32, i32
  }
  func.func @transform_8(%arg0: i32) -> (i32, i32) {
    %c0_i32 = arith.constant 0 : i32
    %c0_i32_0 = arith.constant 0 : i32
    %c0_i32_1 = arith.constant 0 : i32
    return %c0_i32, %c0_i32_0 : i32, i32
  }
  func.func @transform_9(%arg0: i32) -> (i32, i32) {
    %c0_i32 = arith.constant 0 : i32
    %c0_i32_0 = arith.constant 0 : i32
    %c0_i32_1 = arith.constant 0 : i32
    return %c0_i32, %c0_i32_0 : i32, i32
  }
  func.func @transform_10(%arg0: i32) -> (i32, i32) {
    %c0_i32 = arith.constant 0 : i32
    %c0_i32_0 = arith.constant 0 : i32
    %c0_i32_1 = arith.constant 0 : i32
    return %c0_i32, %c0_i32_0 : i32, i32
  }
  func.func @transform_11(%arg0: i32) -> (i32, i32) {
    %c0_i32 = arith.constant 0 : i32
    %c0_i32_0 = arith.constant 0 : i32
    return %arg0, %c0_i32 : i32, i32
  }
  func.func @transform_12(%arg0: i32) -> (i32, i32) {
    %c0_i32 = arith.constant 0 : i32
    %c0_i32_0 = arith.constant 0 : i32
    return %arg0, %c0_i32 : i32, i32
  }
}

</mosaic_0001>

<bundles_post_ra>
// kernel: tpu_custom_call.1
= control target key start
LH: loop header
LB: loop body
LE: loop exit
PB: predicated region body
PF: predicated region fallthrough
CT: control target
= control target key end

     0   :  { %18 = vsyncpa [#allocation3], 0  ;;  %s1421_s0 = inlined_call_operand.hbm [shape: f32[8,64], index: 0, kind: input, shape index: {}]   ;;  %s1422_s1 = inlined_call_operand.hbm [shape: f32[64,128], index: 1, kind: input, shape index: {}]   ;;  %s1423_s2 = inlined_call_operand.hbm [shape: f32[1,128], index: 2, kind: input, shape index: {}]   ;;  %s1424_s3 = inlined_call_operand.hbm [shape: f32[128,128], index: 3, kind: input, shape index: {}]   ;;  %s1425_s4 = inlined_call_operand.vmem [shape: f32[1,128], index: 4, kind: input, shape index: {}]   ;;  %s1426_s5 = inlined_call_operand.hbm [shape: f32[128,128], index: 5, kind: input, shape index: {}]   ;;  %s1427_s6 = inlined_call_operand.vmem [shape: f32[1,128], index: 6, kind: input, shape index: {}]   ;;  %s1428_s7 = inlined_call_operand.hbm [shape: f32[128,256], index: 7, kind: input, shape index: {}]   ;;  %s1429_s8 = inlined_call_operand.vmem [shape: f32[1,256], index: 8, kind: input, shape index: {}]   ;;  %s1430_s9 = inlined_call_operand.hbm [shape: f32[128,384], index: 9, kind: input, shape index: {}]   ;;  %s1431_s10 = inlined_call_operand.vmem [shape: f32[1,384], index: 10, kind: input, shape index: {}]   ;;  %s1432_s11 = inlined_call_operand.hbm [shape: f32[8,256], index: 11, kind: output, shape index: {0}]   ;;  %s1433_s12 = inlined_call_operand.hbm [shape: f32[8,384], index: 12, kind: output, shape index: {1}]  }
   0x1   :  { %19 = vsyncpa [#allocation6], 0 }
   0x2   :  { %20 = vsyncpa [#allocation9], 0 }
   0x3   :  { %21 = vsyncpa [#allocation12], 0 }
   0x4   :  { %22 = vsyncpa [#allocation4], 0 }
   0x5   :  { %23 = vsyncpa [#allocation16], 0  ;;  %s1225_s21 = smov [#allocation5]  }
   0x6   :  { %s39_s22 = sshll.u32 %s1225_s21, 4  ;;  %s40_s22 = int_to_ptr.vmem [resolvable:$true] %s39_s22 }
   0x7   :  { %s1041_s23 = scalar_lea.vmem %s40_s22, 1024  ;;  %p1046_p1 = scmp.lt.s32.totalorder %s40_s22, %s40_s22 }
   0x8   :  { %p1042_p0 = scmp.ne.s32.totalorder %s40_s22, %s1041_s23  ;;  %p1047_p2 = scmp.lt.s32.totalorder %s1041_s23, %s1041_s23 }
   0xa   :  { %p1048_p3 = por %p1047_p2, %p1046_p1 }
   0xc   :  { %p1049_p4 = pnand %p1048_p3, %p1042_p0 }
   0xe   :  { %1052 = shalt.err (!%p1049_p4)
}
   0xf   :  { %s1226_s24 = smov 128   ;;  %s1227_s25 = smov 8  }
  0x10   :  { %45 = dma.hbm_to_vmem [thread:$0]  %s1422_s1, 1024, %s40_s22, [#allocation6], %s1226_s24, %s1226_s24, %s1227_s25  }
  0x11   :  { %s1228_s28 = smov [#allocation8]   ;;  %s1229_s30 = smov [#allocation11]  }
  0x12   :  { %s61_s29 = sshll.u32 %s1228_s28, 4  ;;  %s89_s13 = sshll.u32 %s1229_s30, 4  ;;  %s62_s29 = int_to_ptr.vmem [resolvable:$true] %s61_s29  ;;  %s90_s13 = int_to_ptr.vmem [resolvable:$true] %s89_s13 }
  0x13   :  { %s1061_s14 = scalar_lea.vmem %s62_s29, 2048  ;;  %p1066_p6 = scmp.lt.s32.totalorder %s62_s29, %s62_s29 }
  0x14   :  { %p1062_p5 = scmp.ne.s32.totalorder %s62_s29, %s1061_s14  ;;  %p1067_p7 = scmp.lt.s32.totalorder %s1061_s14, %s1061_s14 }
  0x16   :  { %p1068_p8 = por %p1067_p7, %p1066_p6 }
  0x18   :  { %p1069_p9 = pnand %p1068_p8, %p1062_p5 }
  0x1a   :  { %1072 = shalt.err (!%p1069_p9)
}
  0x1b   :  { %67 = dma.hbm_to_vmem [thread:$0]  %s1424_s3, 2048, %s62_s29, [#allocation9], %s1226_s24, %s1226_s24, %s1227_s25  }
  0x1c   :  { %s1081_s1 = scalar_lea.vmem %s90_s13, 4096  ;;  %p1086_p11 = scmp.lt.s32.totalorder %s90_s13, %s90_s13 }
  0x1d   :  { %p1082_p10 = scmp.ne.s32.totalorder %s90_s13, %s1081_s1  ;;  %p1087_p12 = scmp.lt.s32.totalorder %s1081_s1, %s1081_s1 }
  0x1f   :  { %p1088_p13 = por %p1087_p12, %p1086_p11 }
  0x21   :  { %p1089_p0 = pnand %p1088_p13, %p1082_p10 }
  0x23   :  { %1092 = shalt.err (!%p1089_p0)
}
  0x24   :  { %s1230_s17 = smov 256   ;;  %s1231_s18 = smov 16  }
  0x25   :  { %95 = dma.hbm_to_vmem [thread:$0]  %s1428_s7, 4096, %s90_s13, [#allocation12], %s1230_s17, %s1230_s17, %s1231_s18  }
  0x26   :  { %s1232_s21 = smov [#allocation2]   ;;  %s1233_s23 = smov [#allocation7]  }
  0x27   :  { %s30_s22 = sshll.u32 %s1232_s21, 4  ;;  %s52_s26 = sshll.u32 %s1233_s23, 4  ;;  %s31_s22 = int_to_ptr.vmem [resolvable:$true] %s30_s22  ;;  %s53_s26 = int_to_ptr.vmem [resolvable:$true] %s52_s26 }
  0x28   :  { %s1101_s3 = scalar_lea.vmem %s31_s22, 128  ;;  %p1106_p2 = scmp.lt.s32.totalorder %s31_s22, %s31_s22 }
  0x29   :  { %p1102_p1 = scmp.ne.s32.totalorder %s31_s22, %s1101_s3  ;;  %p1107_p3 = scmp.lt.s32.totalorder %s1101_s3, %s1101_s3 }
  0x2b   :  { %p1108_p4 = por %p1107_p3, %p1106_p2 }
  0x2d   :  { %p1109_p5 = pnand %p1108_p4, %p1102_p1 }
  0x2f   :  { %1112 = shalt.err (!%p1109_p5)
}
  0x30   :  { %33 = dma.hbm_to_vmem [thread:$0]  %s1421_s0, 128, %s31_s22, [#allocation3]  }
  0x31   :  { %s1121_s29 = scalar_lea.vmem %s53_s26, 16  ;;  %s1125_s7 = scalar_lea.vmem %s53_s26, 32 }
  0x32   :  { %p1122_p6 = scmp.ne.s32.totalorder %s53_s26, %s1121_s29  ;;  %p1126_p7 = scmp.lt.s32.totalorder %s53_s26, %s53_s26 }
  0x33   :  { %p1127_p8 = scmp.lt.s32.totalorder %s1125_s7, %s1121_s29 }
  0x35   :  { %p1128_p9 = por %p1127_p8, %p1126_p7 }
  0x37   :  { %p1129_p10 = pnand %p1128_p9, %p1122_p6 }
  0x39   :  { %1132 = shalt.err (!%p1129_p10)
}
  0x3a   :  { %55 = dma.hbm_to_vmem [thread:$0]  %s1423_s2, 16, %s53_s26, [#allocation6]  }
  0x3b   :  { %s1234_s14 = smov [#allocation10]   ;;  %s1235_s16 = smov [#allocation13]  }
  0x3c   :  { %s75_s15 = sshll.u32 %s1234_s14, 4  ;;  %s103_s1 = sshll.u32 %s1235_s16, 4  ;;  %s76_s15 = int_to_ptr.vmem [resolvable:$true] %s75_s15  ;;  %s104_s1 = int_to_ptr.vmem [resolvable:$true] %s103_s1 }
  0x3d   :  { %s1141_s17 = scalar_lea.vmem %s76_s15, 2048  ;;  %p1146_p12 = scmp.lt.s32.totalorder %s76_s15, %s76_s15 }
  0x3e   :  { %p1142_p11 = scmp.ne.s32.totalorder %s76_s15, %s1141_s17  ;;  %p1147_p13 = scmp.lt.s32.totalorder %s1141_s17, %s1141_s17 }
  0x40   :  { %p1148_p0 = por %p1147_p13, %p1146_p12 }
  0x42   :  { %p1149_p1 = pnand %p1148_p0, %p1142_p11 }
  0x44   :  { %1152 = shalt.err (!%p1149_p1)
}
  0x45   :  { %81 = dma.hbm_to_vmem [thread:$0]  %s1426_s5, 2048, %s76_s15, [#allocation9], %s1226_s24, %s1226_s24, %s1227_s25  }
  0x46   :  { %s1161_s2 = scalar_lea.vmem %s104_s1, 6144  ;;  %p1166_p3 = scmp.lt.s32.totalorder %s104_s1, %s104_s1 }
  0x47   :  { %p1162_p2 = scmp.ne.s32.totalorder %s104_s1, %s1161_s2  ;;  %p1167_p4 = scmp.lt.s32.totalorder %s1161_s2, %s1161_s2 }
  0x49   :  { %p1168_p5 = por %p1167_p4, %p1166_p3 }
  0x4b   :  { %p1169_p6 = pnand %p1168_p5, %p1162_p2 }
  0x4d   :  { %1172 = shalt.err (!%p1169_p6)
}
  0x4e   :  { %s1236_s19 = smov 384   ;;  %s1237_s20 = smov 24  }
  0x4f   :  { %109 = dma.hbm_to_vmem [thread:$0]  %s1430_s9, 6144, %s104_s1, [#allocation12], %s1236_s19, %s1236_s19, %s1237_s20  }
  0x50   :  { %1213 = dma.done.wait [#allocation3], 128  }
  0x51   :  { %1214 = vsyncadd [#allocation3], 4294967168 }
  0x52   :  { %1215 = dma.done.wait [#allocation6], 1040  }
  0x53   :  { %1216 = vsyncadd [#allocation6], 4294966256 }
  0x54   :  { %1217 = dma.done.wait [#allocation9], 4096  }
  0x55   :  { %1218 = vsyncadd [#allocation9], 4294963200 }
  0x56   :  { %1219 = dma.done.wait [#allocation12], 10240  }
  0x57   :  { %1220 = vsyncadd [#allocation12], 4294957056  ;;  %v1238_v0 = vmov 0.0   ;;  %vm1239_vm0 = vmmov 0   ;;  %v141_v1 = vld [vmem:[#allocation5 + $0x38] sm:$0xff]  ;;  %v140_v2 = vld [vmem:[#allocation5 + $0x30] sm:$0xff] }
  0x58   :  { %872 = vmatprep.subr.mxu0 %v1238_v0  ;;  %888 = vmatprep.mubr.msk.f32.mxu0 %vm1239_vm0, %v1238_v0  ;;  %v139_v3 = vld [vmem:[#allocation5 + $0x28] sm:$0xff]  ;;  %v239_v4 = vld [vmem:[#allocation8 + $0x78] sm:$0xff]  ;;  %v238_v5 = vld [vmem:[#allocation8 + $0x70] sm:$0xff]  ;;  %vm149_vm1 = vcmask 523264  }
  0x59   :  { %891 = vmatprep.subr.mxu1 %v1238_v0  ;;  %923 = vmatprep.mubr.msk.f32.mxu1 %vm1239_vm0, %v1238_v0  ;;  %v138_v6 = vld [vmem:[#allocation5 + $0x20] sm:$0xff]  ;;  %v237_v7 = vld [vmem:[#allocation8 + $0x68] sm:$0xff]  ;;  %v137_v8 = vld [vmem:[#allocation5 + $0x18] sm:$0xff] }
  0x5a   :  { %873 = vmatpush3.msra.mxu0 %v141_v1  ;;  %892 = vmatpush3.msra.mxu1 %v239_v4  ;;  %v236_v9 = vld [vmem:[#allocation8 + $0x60] sm:$0xff]  ;;  %v136_v10 = vld [vmem:[#allocation5 + $0x10] sm:$0xff]  ;;  %v235_v11 = vld [vmem:[#allocation8 + $0x58] sm:$0xff] }
  0x5b   :  { %874 = vmatprep.subr.mxu0 %v1238_v0  ;;  %893 = vmatprep.subr.mxu1 %v1238_v0  ;;  %v135_v12 = vld [vmem:[#allocation5 + $0x8] sm:$0xff]  ;;  %v234_v13 = vld [vmem:[#allocation8 + $0x50] sm:$0xff]  ;;  %v134_v14 = vld [vmem:[#allocation5] sm:$0xff] }
  0x5c   :  { %875 = vmatpush3.msra.mxu0 %v140_v2  ;;  %894 = vmatpush3.msra.mxu1 %v238_v5  ;;  %v133_v15 = vld [vmem:[#allocation2] sm:$0xff]  ;;  %v233_v17 = vld [vmem:[#allocation8 + $0x48] sm:$0xff]  ;;  %v232_v19 = vld [vmem:[#allocation8 + $0x40] sm:$0xff] }
  0x5d   :  { %876 = vmatprep.subr.mxu0 %v1238_v0  ;;  %895 = vmatprep.subr.mxu1 %v1238_v0  ;;  %v333_v16 = vld [vmem:[#allocation10 + $0x78] sm:$0xff]  ;;  %v332_v18 = vld [vmem:[#allocation10 + $0x70] sm:$0xff]  ;;  %v331_v20 = vld [vmem:[#allocation10 + $0x68] sm:$0xff] }
  0x5e   :  { %877 = vmatpush3.msra.mxu0 %v139_v3  ;;  %896 = vmatpush3.msra.mxu1 %v237_v7  ;;  %v231_v21 = vld [vmem:[#allocation8 + $0x38] sm:$0xff]  ;;  %v330_v22 = vld [vmem:[#allocation10 + $0x60] sm:$0xff]  ;;  %v230_v23 = vld [vmem:[#allocation8 + $0x30] sm:$0xff] }
  0x5f   :  { %878 = vmatprep.subr.mxu0 %v1238_v0  ;;  %897 = vmatprep.subr.mxu1 %v1238_v0  ;;  %v329_v24 = vld [vmem:[#allocation10 + $0x58] sm:$0xff]  ;;  %v229_v25 = vld [vmem:[#allocation8 + $0x28] sm:$0xff]  ;;  %v328_v26 = vld [vmem:[#allocation10 + $0x50] sm:$0xff] }
  0x60   :  { %879 = vmatpush3.msra.mxu0 %v138_v6  ;;  %898 = vmatpush3.msra.mxu1 %v236_v9  ;;  %v228_v27 = vld [vmem:[#allocation8 + $0x20] sm:$0xff]  ;;  %v327_v28 = vld [vmem:[#allocation10 + $0x48] sm:$0xff]  ;;  %v227_v29 = vld [vmem:[#allocation8 + $0x18] sm:$0xff] }
  0x61   :  { %880 = vmatprep.subr.mxu0 %v1238_v0  ;;  %899 = vmatprep.subr.mxu1 %v1238_v0  ;;  %v326_v30 = vld [vmem:[#allocation10 + $0x40] sm:$0xff]  ;;  %v325_v31 = vld [vmem:[#allocation10 + $0x38] sm:$0xff]  ;;  %v324_v32 = vld [vmem:[#allocation10 + $0x30] sm:$0xff] }
  0x62   :  { %881 = vmatpush3.msra.mxu0 %v137_v8  ;;  %900 = vmatpush3.msra.mxu1 %v235_v11  ;;  %v323_v33 = vld [vmem:[#allocation10 + $0x28] sm:$0xff]  ;;  %v322_v34 = vld [vmem:[#allocation10 + $0x20] sm:$0xff]  ;;  %v321_v35 = vld [vmem:[#allocation10 + $0x18] sm:$0xff] }
  0x63   :  { %882 = vmatprep.subr.mxu0 %v1238_v0  ;;  %901 = vmatprep.subr.mxu1 %v1238_v0  ;;  %v226_v36 = vld [vmem:[#allocation8 + $0x10] sm:$0xff]  ;;  %v225_v38 = vld [vmem:[#allocation8 + $0x8] sm:$0xff]  ;;  %v224_v40 = vld [vmem:[#allocation8] sm:$0xff] }
  0x64   :  { %883 = vmatpush3.msra.mxu0 %v136_v10  ;;  %902 = vmatpush3.msra.mxu1 %v234_v13  ;;  %v320_v37 = vld [vmem:[#allocation10 + $0x10] sm:$0xff]  ;;  %v319_v39 = vld [vmem:[#allocation10 + $0x8] sm:$0xff]  ;;  %v318_v41 = vld [vmem:[#allocation10] sm:$0xff] }
  0x65   :  { %884 = vmatprep.subr.mxu0 %v1238_v0  ;;  %903 = vmatprep.subr.mxu1 %v1238_v0  ;;  %v443_v42 = vld [vmem:[#allocation11 + $0xf8] sm:$0xff]  ;;  %v587_v43 = vld [vmem:[#allocation13 + $0x170] sm:$0xff]  ;;  %v586_v50 = vld [vmem:[#allocation13 + $0x168] sm:$0xff] }
  0x66   :  { %885 = vmatpush3.msra.mxu0 %v135_v12  ;;  %904 = vmatpush3.msra.mxu1 %v233_v17  ;;  %v803_v44 = vld [vmem:[#allocation7] ss:$0 sm:$0xff]  ;;  %v442_v49 = vld [vmem:[#allocation11 + $0xf0] sm:$0xff]  ;;  %v441_v51 = vld [vmem:[#allocation11 + $0xe8] sm:$0xff] }
  0x67   :  { %886 = vmatprep.subr.mxu0 %v1238_v0  ;;  %905 = vmatprep.subr.mxu1 %v1238_v0  ;;  %v584_v52 = vld [vmem:[#allocation13 + $0x158] sm:$0xff]  ;;  %v440_v53 = vld [vmem:[#allocation11 + $0xe0] sm:$0xff]  ;;  %v583_v54 = vld [vmem:[#allocation13 + $0x150] sm:$0xff] }
  0x68   :  { %887 = vmatpush3.msra.mxu0 %v134_v14  ;;  %906 = vmatpush3.msra.mxu1 %v232_v19  ;;  %v439_v55 = vld [vmem:[#allocation11 + $0xd8] sm:$0xff]  ;;  %v581_v56 = vld [vmem:[#allocation13 + $0x140] sm:$0xff]  ;;  %v438_v57 = vld [vmem:[#allocation11 + $0xd0] sm:$0xff] }
  0x69   :  { %889 = vmatmul.mubr.msk.f32.vlgmr.msra.gmra.mxu0 %vm149_vm1, %v133_v15  ;;  %926 = vmatprep.subr.mxu0 %v1238_v0  ;;  %v580_v58 = vld [vmem:[#allocation13 + $0x138] sm:$0xff]  ;;  %v437_v59 = vld [vmem:[#allocation11 + $0xc8] sm:$0xff]  ;;  %v436_v61 = vld [vmem:[#allocation11 + $0xc0] sm:$0xff] }
  0x6a   :  { %927 = vmatpush3.msra.mxu0 %v333_v16  ;;  %907 = vmatprep.subr.mxu1 %v1238_v0  ;;  %v578_v60 = vld [vmem:[#allocation13 + $0x128] sm:$0xff]  ;;  %v577_v62 = vld [vmem:[#allocation13 + $0x120] sm:$0xff]  ;;  %v435_v63 = vld [vmem:[#allocation11 + $0xb8] sm:$0xff] }
  0x6b   :  { %928 = vmatprep.subr.mxu0 %v1238_v0  ;;  %908 = vmatpush3.msra.mxu1 %v231_v21  ;;  %v575_v1 = vld [vmem:[#allocation13 + $0x110] sm:$0xff]  ;;  %v574_v3 = vld [vmem:[#allocation13 + $0x108] sm:$0xff]  ;;  %v572_v5 = vld [vmem:[#allocation13 + $0xf8] sm:$0xff] }
  0x6c   :  { %929 = vmatpush3.msra.mxu0 %v332_v18  ;;  %909 = vmatprep.subr.mxu1 %v1238_v0  ;;  %v434_v2 = vld [vmem:[#allocation11 + $0xb0] sm:$0xff]  ;;  %v433_v4 = vld [vmem:[#allocation11 + $0xa8] sm:$0xff]  ;;  %v432_v6 = vld [vmem:[#allocation11 + $0xa0] sm:$0xff] }
  0x6d   :  { %930 = vmatprep.subr.mxu0 %v1238_v0  ;;  %910 = vmatpush3.msra.mxu1 %v230_v23  ;;  %v571_v7 = vld [vmem:[#allocation13 + $0xf0] sm:$0xff]  ;;  %v431_v8 = vld [vmem:[#allocation11 + $0x98] sm:$0xff]  ;;  %v569_v9 = vld [vmem:[#allocation13 + $0xe0] sm:$0xff] }
  0x6e   :  { %931 = vmatpush3.msra.mxu0 %v331_v20  ;;  %911 = vmatprep.subr.mxu1 %v1238_v0  ;;  %v430_v10 = vld [vmem:[#allocation11 + $0x90] sm:$0xff]  ;;  %v568_v11 = vld [vmem:[#allocation13 + $0xd8] sm:$0xff]  ;;  %v429_v12 = vld [vmem:[#allocation11 + $0x88] sm:$0xff] }
  0x6f   :  { %932 = vmatprep.subr.mxu0 %v1238_v0  ;;  %912 = vmatpush3.msra.mxu1 %v229_v25  ;;  %v566_v13 = vld [vmem:[#allocation13 + $0xc8] sm:$0xff]  ;;  %v428_v14 = vld [vmem:[#allocation11 + $0x80] sm:$0xff]  ;;  %v427_v16 = vld [vmem:[#allocation11 + $0x78] sm:$0xff] }
  0x70   :  { %933 = vmatpush3.msra.mxu0 %v330_v22  ;;  %913 = vmatprep.subr.mxu1 %v1238_v0  ;;  %v565_v15 = vld [vmem:[#allocation13 + $0xc0] sm:$0xff]  ;;  %v563_v17 = vld [vmem:[#allocation13 + $0xb0] sm:$0xff]  ;;  %v562_v19 = vld [vmem:[#allocation13 + $0xa8] sm:$0xff] }
  0x71   :  { %934 = vmatprep.subr.mxu0 %v1238_v0  ;;  %914 = vmatpush3.msra.mxu1 %v228_v27  ;;  %v426_v18 = vld [vmem:[#allocation11 + $0x70] sm:$0xff]  ;;  %v425_v20 = vld [vmem:[#allocation11 + $0x68] sm:$0xff]  ;;  %v560_v21 = vld [vmem:[#allocation13 + $0x98] sm:$0xff] }
  0x72   :  { %935 = vmatpush3.msra.mxu0 %v329_v24  ;;  %915 = vmatprep.subr.mxu1 %v1238_v0  ;;  %v424_v22 = vld [vmem:[#allocation11 + $0x60] sm:$0xff]  ;;  %v559_v23 = vld [vmem:[#allocation13 + $0x90] sm:$0xff]  ;;  %v423_v24 = vld [vmem:[#allocation11 + $0x58] sm:$0xff] }
  0x73   :  { %936 = vmatprep.subr.mxu0 %v1238_v0  ;;  %916 = vmatpush3.msra.mxu1 %v227_v29  ;;  %v557_v25 = vld [vmem:[#allocation13 + $0x80] sm:$0xff]  ;;  %v556_v27 = vld [vmem:[#allocation13 + $0x78] sm:$0xff]  ;;  %v554_v29 = vld [vmem:[#allocation13 + $0x68] sm:$0xff] }
  0x74   :  { %937 = vmatpush3.msra.mxu0 %v328_v26  ;;  %917 = vmatprep.subr.mxu1 %v1238_v0  ;;  %v422_v26 = vld [vmem:[#allocation11 + $0x50] sm:$0xff] }
  0x75   :  { %938 = vmatprep.subr.mxu0 %v1238_v0  ;;  %958 = vmatprep.mubr.msk.f32.mxu0 %vm1239_vm0, %v1238_v0 }
  0x76   :  { %939 = vmatpush3.msra.mxu0 %v327_v28  ;;  %918 = vmatpush3.msra.mxu1 %v226_v36  ;;  %v421_v28 = vld [vmem:[#allocation11 + $0x48] sm:$0xff] }
  0x77   :  { %940 = vmatprep.subr.mxu0 %v1238_v0  ;;  %919 = vmatprep.subr.mxu1 %v1238_v0  ;;  %v417_v36 = vld [vmem:[#allocation11 + $0x28] sm:$0xff] }
  0x78   :  { %941 = vmatpush3.msra.mxu0 %v326_v30  ;;  %920 = vmatpush3.msra.mxu1 %v225_v38  ;;  %v420_v30 = vld [vmem:[#allocation11 + $0x40] sm:$0xff] }
  0x79   :  { %942 = vmatprep.subr.mxu0 %v1238_v0  ;;  %921 = vmatprep.subr.mxu1 %v1238_v0  ;;  %v416_v38 = vld [vmem:[#allocation11 + $0x20] sm:$0xff] }
  0x7a   :  { %943 = vmatpush3.msra.mxu0 %v325_v31  ;;  %922 = vmatpush3.msra.mxu1 %v224_v40  ;;  %v553_v31 = vld [vmem:[#allocation13 + $0x60] sm:$0xff]  ;;  %v547_v40 = vld [vmem:[#allocation13 + $0x30] sm:$0xff] }
  0x7b   :  { %944 = vmatprep.subr.mxu0 %v1238_v0  ;;  %456 = vmatprep.subr.mxu1 %v443_v42  ;;  %v545_v42 = vld [vmem:[#allocation13 + $0x20] sm:$0xff] }
  0x7c   :  { %945 = vmatpush3.msra.mxu0 %v324_v32  ;;  %v419_v32 = vld [vmem:[#allocation11 + $0x38] sm:$0xff] }
  0x7d   :  { %946 = vmatprep.subr.mxu0 %v1238_v0 }
  0x7e   :  { %947 = vmatpush3.msra.mxu0 %v323_v33  ;;  %v551_v33 = vld [vmem:[#allocation13 + $0x50] sm:$0xff] }
  0x7f   :  { %948 = vmatprep.subr.mxu0 %v1238_v0 }
  0x80   :  { %949 = vmatpush3.msra.mxu0 %v322_v34  ;;  %v418_v34 = vld [vmem:[#allocation11 + $0x30] sm:$0xff] }
  0x81   :  { %950 = vmatprep.subr.mxu0 %v1238_v0 }
  0x82   :  { %951 = vmatpush3.msra.mxu0 %v321_v35  ;;  %v550_v35 = vld [vmem:[#allocation13 + $0x48] sm:$0xff] }
  0x83   :  { %952 = vmatprep.subr.mxu0 %v1238_v0 }
  0x84   :  { %953 = vmatpush3.msra.mxu0 %v320_v37  ;;  %v548_v37 = vld [vmem:[#allocation13 + $0x38] sm:$0xff] }
  0x85   :  { %954 = vmatprep.subr.mxu0 %v1238_v0 }
  0x86   :  { %955 = vmatpush3.msra.mxu0 %v319_v39  ;;  %v415_v39 = vld [vmem:[#allocation11 + $0x18] sm:$0xff] }
  0x87   :  { %956 = vmatprep.subr.mxu0 %v1238_v0 }
  0x88   :  { %957 = vmatpush3.msra.mxu0 %v318_v41  ;;  %v414_v41 = vld [vmem:[#allocation11 + $0x10] sm:$0xff] }
  0x89   :  { %606 = vmatprep.subr.mxu0 %v587_v43  ;;  %v413_v43 = vld [vmem:[#allocation11 + $0x8] sm:$0xff] }
 0x129   :  { %v219_v45 = vpop.f32.mrf.mxu0 }
 0x12a   :  { %v220_v46 = vadd.f32 %v803_v44, %v219_v45  ;;  %v544_v44 = vld [vmem:[#allocation13 + $0x18] sm:$0xff]  ;;  %v412_v45 = vld [vmem:[#allocation11] sm:$0xff] }
 0x12b   :  { %v890_v47 = vpop.f32.mrf.mxu0 }
 0x12c   :  { %v223_v48 = vmax.f32 %v220_v46, 0.0  ;;  %v542_v46 = vld [vmem:[#allocation13 + $0x8] sm:$0xff]  ;;  %v541_v47 = vld [vmem:[#allocation13] sm:$0xff] }
 0x12e   :  { %924 = vmatmul.mubr.f32.vlgmr.msra.gmra.mxu1 %v223_v48  ;;  %959 = vmatmul.mubr.f32.vlgmr.msra.gmra.mxu0 %v223_v48  ;;  %v805_v48 = vld [vmem:[%s1425_s4] ss:$0 sm:$0xff] }
 0x12f   :  { %457 = vmatpush1.msra.mxu1 %v442_v49  ;;  %607 = vmatpush1.msra.mxu0 %v586_v50  ;;  %v806_v49 = vld [vmem:[%s1427_s6] ss:$0 sm:$0xff] }
 0x130   :  { %458 = vmatprep.subr.mxu1 %v441_v51  ;;  %608 = vmatprep.subr.mxu0 %v584_v52 }
 0x131   :  { %459 = vmatpush1.msra.mxu1 %v440_v53  ;;  %609 = vmatpush1.msra.mxu0 %v583_v54 }
 0x132   :  { %460 = vmatprep.subr.mxu1 %v439_v55  ;;  %610 = vmatprep.subr.mxu0 %v581_v56 }
 0x133   :  { %461 = vmatpush1.msra.mxu1 %v438_v57  ;;  %611 = vmatpush1.msra.mxu0 %v580_v58  ;;  %v588_v58 = vld [vmem:[#allocation13 + $0x178] sm:$0xff] }
 0x134   :  { %462 = vmatprep.subr.mxu1 %v437_v59  ;;  %612 = vmatprep.subr.mxu0 %v578_v60  ;;  %v585_v59 = vld [vmem:[#allocation13 + $0x160] sm:$0xff]  ;;  %v582_v60 = vld [vmem:[#allocation13 + $0x148] sm:$0xff] }
 0x135   :  { %463 = vmatpush1.msra.mxu1 %v436_v61  ;;  %613 = vmatpush1.msra.mxu0 %v577_v62  ;;  %v579_v61 = vld [vmem:[#allocation13 + $0x130] sm:$0xff]  ;;  %v576_v62 = vld [vmem:[#allocation13 + $0x118] sm:$0xff] }
 0x136   :  { %464 = vmatprep.subr.mxu1 %v435_v63  ;;  %614 = vmatprep.subr.mxu0 %v575_v1  ;;  %v573_v63 = vld [vmem:[#allocation13 + $0x100] sm:$0xff]  ;;  %v570_v1 = vld [vmem:[#allocation13 + $0xe8] sm:$0xff] }
 0x137   :  { %465 = vmatpush1.msra.mxu1 %v434_v2  ;;  %615 = vmatpush1.msra.mxu0 %v574_v3  ;;  %v567_v2 = vld [vmem:[#allocation13 + $0xd0] sm:$0xff]  ;;  %v564_v3 = vld [vmem:[#allocation13 + $0xb8] sm:$0xff] }
 0x138   :  { %466 = vmatprep.subr.mxu1 %v433_v4  ;;  %616 = vmatprep.subr.mxu0 %v572_v5  ;;  %v561_v4 = vld [vmem:[#allocation13 + $0xa0] sm:$0xff]  ;;  %v558_v5 = vld [vmem:[#allocation13 + $0x88] sm:$0xff] }
 0x139   :  { %467 = vmatpush1.msra.mxu1 %v432_v6  ;;  %617 = vmatpush1.msra.mxu0 %v571_v7  ;;  %v555_v6 = vld [vmem:[#allocation13 + $0x70] sm:$0xff]  ;;  %v552_v7 = vld [vmem:[#allocation13 + $0x58] sm:$0xff] }
 0x13a   :  { %468 = vmatprep.subr.mxu1 %v431_v8  ;;  %618 = vmatprep.subr.mxu0 %v569_v9  ;;  %v549_v8 = vld [vmem:[#allocation13 + $0x40] sm:$0xff]  ;;  %v546_v9 = vld [vmem:[#allocation13 + $0x28] sm:$0xff] }
 0x13b   :  { %469 = vmatpush1.msra.mxu1 %v430_v10  ;;  %619 = vmatpush1.msra.mxu0 %v568_v11  ;;  %v543_v10 = vld [vmem:[#allocation13 + $0x10] sm:$0xff]  ;;  %v446_v11 = vlaneseq }
 0x13c   :  { %470 = vmatprep.subr.mxu1 %v429_v12  ;;  %620 = vmatprep.subr.mxu0 %v566_v13 }
 0x13d   :  { %471 = vmatpush1.msra.mxu1 %v428_v14  ;;  %621 = vmatpush1.msra.mxu0 %v565_v15  ;;  %v447_v12 = vshrl.u32 %v446_v11, 7  ;;  %v444_v14 = vld [vmem:[%s1429_s8] sm:$0x3]  ;;  %s1240_s8 = smov [#allocation14]  }
 0x13e   :  { %472 = vmatprep.subr.mxu1 %v427_v16  ;;  %622 = vmatprep.subr.mxu0 %v563_v17  ;;  %v589_v15 = vld [vmem:[%s1431_s10] sm:$0x7]  ;;  %s777_s10 = sshll.u32 %s1240_s8, 4  ;;  %s778_s10 = int_to_ptr.vmem [resolvable:$true] %s777_s10 }
 0x13f   :  { %473 = vmatpush1.msra.mxu1 %v426_v18  ;;  %623 = vmatpush1.msra.mxu0 %v562_v19  ;;  %v448_v13 = vsub.s32 0, %v447_v12  ;;  %v452_v16 = vsub.s32 1, %v447_v12  ;;  %s1173_s3 = scalar_lea.vmem %s778_s10, 256  ;;  %p1178_p8 = scmp.lt.s32.totalorder %s778_s10, %s778_s10 }
 0x140   :  { %474 = vmatprep.subr.mxu1 %v425_v20  ;;  %624 = vmatprep.subr.mxu0 %v560_v21  ;;  %p1174_p7 = scmp.ne.s32.totalorder %s778_s10, %s1173_s3  ;;  %p1179_p9 = scmp.lt.s32.totalorder %s1173_s3, %s1173_s3 }
 0x141   :  { %475 = vmatpush1.msra.mxu1 %v424_v22  ;;  %625 = vmatpush1.msra.mxu0 %v559_v23  ;;  %v449_v17 = vrot.slane %v444_v14, %v448_v13  ;;  %v594_v18 = vrot.slane %v589_v15, %v448_v13  ;;  %v453_v19 = vrot.slane %v444_v14, %v452_v16 }
 0x142   :  { %476 = vmatprep.subr.mxu1 %v423_v24  ;;  %626 = vmatprep.subr.mxu0 %v557_v25  ;;  %v598_v20 = vrot.slane %v589_v15, %v452_v16  ;;  %p1180_p10 = por %p1179_p9, %p1178_p8 }
 0x143   :  { %477 = vmatpush1.msra.mxu1 %v422_v26  ;;  %627 = vmatpush1.msra.mxu0 %v556_v27 }
 0x144   :  { %478 = vmatprep.subr.mxu1 %v421_v28  ;;  %628 = vmatprep.subr.mxu0 %v554_v29  ;;  %p1181_p11 = pnand %p1180_p10, %p1174_p7 }
 0x145   :  { %479 = vmatpush1.msra.mxu1 %v420_v30  ;;  %629 = vmatpush1.msra.mxu0 %v553_v31 }
 0x146   :  { %480 = vmatprep.subr.mxu1 %v419_v32  ;;  %630 = vmatprep.subr.mxu0 %v551_v33 }
 0x147   :  { %481 = vmatpush1.msra.mxu1 %v418_v34  ;;  %631 = vmatpush1.msra.mxu0 %v550_v35 }
 0x148   :  { %482 = vmatprep.subr.mxu1 %v417_v36  ;;  %632 = vmatprep.subr.mxu0 %v548_v37 }
 0x149   :  { %483 = vmatpush1.msra.mxu1 %v416_v38  ;;  %520 = vmatprep.mubr.f32.mxu1 %v1238_v0 }
 0x14a   :  { %670 = vmatprep.mubr.f32.mxu0 %v1238_v0  ;;  %484 = vmatprep.subr.mxu1 %v415_v39 }
 0x14b   :  { %633 = vmatpush1.msra.mxu0 %v547_v40  ;;  %485 = vmatpush1.msra.mxu1 %v414_v41 }
 0x14c   :  { %634 = vmatprep.subr.mxu0 %v545_v42  ;;  %486 = vmatprep.subr.mxu1 %v413_v43  ;;  %v601_v42 = vsub.s32 2, %v447_v12 }
 0x14d   :  { %635 = vmatpush1.msra.mxu0 %v544_v44  ;;  %487 = vmatpush1.msra.mxu1 %v412_v45 }
 0x14e   :  { %636 = vmatprep.subr.mxu0 %v542_v46  ;;  %961 = vmatprep.subr.mxu1 %v1238_v0  ;;  %v602_v43 = vrot.slane %v589_v15, %v601_v42 }
 0x14f   :  { %637 = vmatpush1.msra.mxu0 %v541_v47 }
 0x1ee   :  { %v313_v50 = vpop.f32.mrf.mxu1  ;;  %v407_v51 = vpop.f32.mrf.mxu0 }
 0x1ef   :  { %v314_v52 = vadd.f32 %v805_v48, %v313_v50  ;;  %v408_v53 = vadd.f32 %v806_v49, %v407_v51 }
 0x1f0   :  { %v925_v54 = vpop.f32.mrf.mxu1  ;;  %v960_v55 = vpop.f32.mrf.mxu0 }
 0x1f1   :  { %v317_v56 = vmax.f32 %v314_v52, 0.0  ;;  %v411_v57 = vmax.f32 %v408_v53, 0.0 }
 0x1f3   :  { %521 = vmatmul.mubr.f32.vlgmr.msra.gmra.mxu1 %v317_v56  ;;  %671 = vmatmul.mubr.f32.vlgmr.msra.gmra.mxu0 %v411_v57 }
 0x1f4   :  { %962 = vmatpush3.msra.mxu1 %v588_v58  ;;  %993 = vmatprep.mubr.msk.f32.mxu1 %vm1239_vm0, %v1238_v0 }
 0x1f5   :  { %963 = vmatprep.subr.mxu1 %v1238_v0 }
 0x1f6   :  { %964 = vmatpush3.msra.mxu1 %v585_v59 }
 0x1f7   :  { %965 = vmatprep.subr.mxu1 %v1238_v0 }
 0x1f8   :  { %966 = vmatpush3.msra.mxu1 %v582_v60 }
 0x1f9   :  { %967 = vmatprep.subr.mxu1 %v1238_v0 }
 0x1fa   :  { %968 = vmatpush3.msra.mxu1 %v579_v61 }
 0x1fb   :  { %969 = vmatprep.subr.mxu1 %v1238_v0 }
 0x1fc   :  { %970 = vmatpush3.msra.mxu1 %v576_v62 }
 0x1fd   :  { %971 = vmatprep.subr.mxu1 %v1238_v0 }
 0x1fe   :  { %972 = vmatpush3.msra.mxu1 %v573_v63 }
 0x1ff   :  { %973 = vmatprep.subr.mxu1 %v1238_v0 }
 0x200   :  { %974 = vmatpush3.msra.mxu1 %v570_v1 }
 0x201   :  { %975 = vmatprep.subr.mxu1 %v1238_v0 }
 0x202   :  { %976 = vmatpush3.msra.mxu1 %v567_v2 }
 0x203   :  { %977 = vmatprep.subr.mxu1 %v1238_v0 }
 0x204   :  { %978 = vmatpush3.msra.mxu1 %v564_v3 }
 0x205   :  { %979 = vmatprep.subr.mxu1 %v1238_v0 }
 0x206   :  { %980 = vmatpush3.msra.mxu1 %v561_v4 }
 0x207   :  { %981 = vmatprep.subr.mxu1 %v1238_v0 }
 0x208   :  { %982 = vmatpush3.msra.mxu1 %v558_v5 }
 0x209   :  { %983 = vmatprep.subr.mxu1 %v1238_v0 }
 0x20a   :  { %984 = vmatpush3.msra.mxu1 %v555_v6 }
 0x20b   :  { %985 = vmatprep.subr.mxu1 %v1238_v0 }
 0x20c   :  { %986 = vmatpush3.msra.mxu1 %v552_v7 }
 0x20d   :  { %987 = vmatprep.subr.mxu1 %v1238_v0 }
 0x20e   :  { %988 = vmatpush3.msra.mxu1 %v549_v8 }
 0x20f   :  { %989 = vmatprep.subr.mxu1 %v1238_v0 }
 0x210   :  { %990 = vmatpush3.msra.mxu1 %v546_v9 }
 0x211   :  { %991 = vmatprep.subr.mxu1 %v1238_v0 }
 0x212   :  { %992 = vmatpush3.msra.mxu1 %v543_v10 }
 0x213   :  { %994 = vmatmul.mubr.f32.vlgmr.msra.gmra.mxu1 %v411_v57 }
 0x2b3   :  { %v522_v21 = vpop.f32.mrf.mxu1  ;;  %v672_v0 = vpop.f32.mrf.mxu0 }
 0x2b4   :  { %v523_v22 = vadd.f32 %v522_v21, %v449_v17  ;;  %v673_v23 = vadd.f32 %v672_v0, %v594_v18 }
 0x2b5   :  { %v524_v24 = vpop.f32.mrf.mxu1  ;;  %v674_v25 = vpop.f32.mrf.mxu0 }
 0x2b6   :  { %v807_v26 = vmul.f32 -1.442695, %v523_v22  ;;  %v809_v27 = vmul.f32 -2.0, %v673_v23  ;;  %v525_v28 = vadd.f32 %v524_v24, %v453_v19  ;;  %v675_v29 = vadd.f32 %v674_v25, %v598_v20 }
 0x2b8   :  { %1013 = vpow2.f32 %v807_v26  ;;  %v753_v30 = vmul.f32 1.442695, %v809_v27  ;;  %v808_v31 = vmul.f32 -1.442695, %v525_v28  ;;  %v810_v32 = vmul.f32 -2.0, %v675_v29 }
 0x2ba   :  { %1015 = vpow2.f32 %v753_v30  ;;  %v755_v33 = vmul.f32 1.442695, %v810_v32 }
 0x2bb   :  { %1017 = vpow2.f32 %v808_v31 }
 0x2bc   :  { %1019 = vpow2.f32 %v755_v33 }
 0x2c5   :  { %v1014_v34 = vpop.eup %1013 }
 0x2c6   :  { %v533_v35 = vadd.f32 1.0, %v1014_v34 }
 0x2c7   :  { %v1016_v36 = vpop.eup %1015 }
 0x2c8   :  { %v1018_v37 = vpop.eup %1017  ;;  %1021 = vrcp.f32 %v533_v35  ;;  %v759_v38 = vadd.f32 1.0, %v1016_v36 }
 0x2c9   :  { %v1020_v39 = vpop.eup %1019  ;;  %v534_v40 = vadd.f32 1.0, %v1018_v37 }
 0x2ca   :  { %1023 = vrcp.f32 %v759_v38  ;;  %v760_v41 = vadd.f32 1.0, %v1020_v39 }
 0x2cb   :  { %1025 = vrcp.f32 %v534_v40 }
 0x2cc   :  { %1027 = vrcp.f32 %v760_v41 }
 0x2d3   :  { %v743_v44 = vpop.f32.mrf.mxu1 }
 0x2d4   :  { %v744_v45 = vadd.f32 %v743_v44, %v602_v43 }
 0x2d5   :  { %v1022_v46 = vpop.eup %1021  ;;  %v995_v47 = vpop.f32.mrf.mxu1 }
 0x2d6   :  { %539 = vst [vmem:[#allocation14] sm:$0xff] %v1022_v46  ;;  %v811_v48 = vmul.f32 -2.0, %v744_v45 }
 0x2d7   :  { %v1024_v49 = vpop.eup %1023 }
 0x2d8   :  { %v1026_v50 = vpop.eup %1025  ;;  %768 = vst [vmem:[#allocation15] sm:$0xff] %v1024_v49  ;;  %v757_v51 = vmul.f32 1.442695, %v811_v48 }
 0x2d9   :  { %v1028_v52 = vpop.eup %1027  ;;  %540 = vst [vmem:[#allocation14 + $0x8] sm:$0xff] %v1026_v50 }
 0x2da   :  { %769 = vst [vmem:[#allocation15 + $0x8] sm:$0xff] %v1028_v52  ;;  %1029 = vpow2.f32 %v757_v51 }
 0x2db   :  { %1184 = shalt.err (!%p1181_p11)
}
 0x2dc   :  { %780 = dma.vmem_to_hbm [thread:$0]  %s778_s10, 256, %s1432_s11, [#allocation4]  }
 0x2dd   :  { %s1241_s29 = smov [#allocation15]  }
 0x2de   :  { %s787_s7 = sshll.u32 %s1241_s29, 4  ;;  %s788_s7 = int_to_ptr.vmem [resolvable:$true] %s787_s7 }
 0x2df   :  { %s1193_s30 = scalar_lea.vmem %s788_s7, 384  ;;  %p1198_p13 = scmp.lt.s32.totalorder %s788_s7, %s788_s7 }
 0x2e0   :  { %p1194_p12 = scmp.ne.s32.totalorder %s788_s7, %s1193_s30  ;;  %p1199_p0 = scmp.lt.s32.totalorder %s1193_s30, %s1193_s30 }
 0x2e2   :  { %p1200_p1 = por %p1199_p0, %p1198_p13 }
 0x2e4   :  { %p1201_p2 = pnand %p1200_p1, %p1194_p12 }
 0x2e7   :  { %v1030_v53 = vpop.eup %1029 }
 0x2e8   :  { %v761_v54 = vadd.f32 1.0, %v1030_v53 }
 0x2ea   :  { %1031 = vrcp.f32 %v761_v54 }
 0x2f7   :  { %v1032_v55 = vpop.eup %1031 }
 0x2f8   :  { %770 = vst [vmem:[#allocation15 + $0x10] sm:$0xff] %v1032_v55 }
 0x2f9   :  { %1204 = shalt.err (!%p1201_p2)
}
 0x2fa   :  { %790 = dma.vmem_to_hbm [thread:$0]  %s788_s7, 384, %s1433_s12, [#allocation16]  }
 0x2fb   :  { %1221 = dma.done.wait [#allocation4], 256  }
 0x2fc   :  { %1222 = vsyncadd [#allocation4], 4294967040 }
 0x2fd   :  { %1223 = dma.done.wait [#allocation16], 384  }
 0x2fe   :  { %1224 = vsyncadd [#allocation16], 4294966912 }
 0x2ff   :  { %797 = vsyncpa [#allocation3], 1 }
 0x300   :  { %798 = vsyncpa [#allocation6], 1 }
 0x301   :  { %799 = vsyncpa [#allocation9], 1 }
 0x302   :  { %800 = vsyncpa [#allocation12], 1 }
 0x303   :  { %801 = vsyncpa [#allocation4], 1 }
 0x304   :  { %802 = vsyncpa [#allocation16], 1 }

</bundles_post_ra>
